<compile_context>
chip_gen: v5e
topology: v5e:2x2
jax: 0.10.0
libtpu: 0.0.40
codegen_flags: <defaults>
</compile_context>

<pallas_src>
import jax
import jax.numpy as jnp
from jax import lax
from jax.experimental import pallas as pl
from jax.experimental.pallas import tpu as pltpu


def _stats_kernel(p_ref, w_ref, b_ref, sum_ref, sumsq_ref):
    """Pass 1: GEMM + bias for one (C_P8, tile_s) conv tile; emit per-tile
    per-channel sum and sum-of-squares.  The conv tile itself never touches HBM.

    p_ref:     (1, KKC, tile_s) bf16   im2col patches (transposed layout)
    w_ref:     (C_P8, KKC)      bf16   spatially flipped kernel, rows = out channels
    b_ref:     (C_P8, 1)        f32
    sum_ref:   (1, 1, C_P8, 1)  f32    per-tile partial sum
    sumsq_ref: (1, 1, C_P8, 1)  f32    per-tile partial sum of squares
    """
    acc = jnp.dot(w_ref[...], p_ref[0], preferred_element_type=jnp.float32)
    acc = acc + b_ref[...]
    sum_ref[0, 0] = jnp.sum(acc, axis=1, keepdims=True)
    sumsq_ref[0, 0] = jnp.sum(acc * acc, axis=1, keepdims=True)


def _conv_bn_relu_kernel(p_ref, w_ref, b_ref, scale_ref, shift_ref, o_ref):
    """Pass 2: recompute the GEMM, apply the precomputed BN affine + ReLU.

    o_ref: (1, C_P8, tile_s) f32 -- lane-dense store (tile_s % 128 == 0), no pad.
    """
    acc = jnp.dot(w_ref[...], p_ref[0], preferred_element_type=jnp.float32)
    acc = acc + b_ref[...]
    o_ref[0] = jnp.maximum(acc * scale_ref[...] + shift_ref[...],
                           0.0).astype(o_ref.dtype)


def _vmem_budget_bytes():
    try:
        phys = pltpu.get_tpu_info().vmem_capacity_bytes
    except Exception:
        phys = 64 * 1024 * 1024          # conservative default (v7x per-TC VMEM)
    return int(min(phys * 3 // 4, 100 * 1024 * 1024))


def _pick_tile_s(S, N, KKC, C_P8, vmem_budget):
    """Largest multiple-of-128 divisor of S that fits VMEM (double-buffered) and
    still leaves >= ~4 grid steps for DMA/compute overlap when possible."""
    if S % 128 != 0:
        # TODO(synk): masked/BoundedSlice tail for spatial sizes not mult. of 128.
        return S
    per_col = 2 * (KKC * 2) + 2 * (C_P8 * 4) + 64   # bf16 patches x2 + f32 out x2
    cap = max(128, ((vmem_budget // 2) // per_col) // 128 * 128)
    cands = [t for t in range(128, S + 1, 128) if S % t == 0 and t <= cap]
    if not cands:
        return 128
    for t in reversed(cands):
        if N * (S // t) >= 4:
            return t
    return cands[0]


def conv2dtrans_bn_relu(x_nchw, weight_t, bias, gamma, beta, *,
                        stride, padding, output_padding, dilation, eps=1e-4,
                        input_dtype=jnp.bfloat16):
    """x_nchw: (N, C_in, H, W); weight_t: (C_in, C_out, K, K) (PyTorch layout).
    ConvTranspose2d(+bias) -> BatchNorm2d(training batch stats) -> ReLU, NCHW out.
    groups == 1 assumed (as in the demo config)."""
    N, C_in, H, W = x_nchw.shape
    assert weight_t.shape[0] == C_in
    C_out, K = weight_t.shape[1], weight_t.shape[2]
    C_P8 = (C_out + 7) // 8 * 8          # channel rows padded to a sublane multiple

    H_out = (H - 1) * stride - 2 * padding + dilation * (K - 1) + output_padding + 1
    W_out = (W - 1) * stride - 2 * padding + dilation * (K - 1) + output_padding + 1
    S = H_out * W_out
    KKC = K * K * C_in

    # --- glue (stays in NCHW, no transpose): zero-insertion + padding turn the
    # transposed conv into a plain stride-1 conv with the spatially flipped kernel.
    x = x_nchw.astype(jnp.float32)
    Hu = (H - 1) * stride + 1
    Wu = (W - 1) * stride + 1
    x_up = jnp.zeros((N, C_in, Hu, Wu), jnp.float32)
    x_up = x_up.at[:, :, ::stride, ::stride].set(x)
    pad_lo = dilation * (K - 1) - padding
    pad_hi = pad_lo + output_padding
    assert pad_lo >= 0  # TODO(synk): padding > dilation*(K-1) needs output cropping
    x_pad = jnp.pad(x_up, ((0, 0), (0, 0), (pad_lo, pad_hi), (pad_lo, pad_hi)))

    # --- glue: im2col in the "transposed" layout (N, K*K*C_in, H_out*W_out), bf16.
    # Lane dim = large spatial axis; contraction row order = (kh, kw, c_in).
    # TODO(synk): build patches in-kernel from x_pad windows (+ stride^2 phase
    #             decomposition) to avoid the K*K HBM read amplification.
    cols = [x_pad[:, :, kh * dilation:kh * dilation + H_out,
                  kw * dilation:kw * dilation + W_out]
            for kh in range(K) for kw in range(K)]
    patches = jnp.stack(cols, axis=1).reshape(N, KKC, S).astype(input_dtype)

    # Equivalent direct-conv weight, transposed for the (C, KKC) x (KKC, S) GEMM.
    w = jnp.transpose(jnp.flip(weight_t, axis=(2, 3)), (2, 3, 0, 1))  # (K,K,Cin,Cout)
    wT = w.reshape(KKC, C_out).astype(jnp.float32).T                  # (Cout, KKC)
    wT_p = jnp.zeros((C_P8, KKC), jnp.float32).at[:C_out].set(wT).astype(input_dtype)

    bias_p = jnp.zeros((C_P8, 1), jnp.float32).at[:C_out, 0].set(bias.astype(jnp.float32))
    gamma_p = jnp.zeros((C_P8, 1), jnp.float32).at[:C_out, 0].set(gamma.astype(jnp.float32))
    beta_p = jnp.zeros((C_P8, 1), jnp.float32).at[:C_out, 0].set(beta.astype(jnp.float32))

    vmem_limit = _vmem_budget_bytes()
    tile_s = _pick_tile_s(S, N, KKC, C_P8, vmem_limit)
    s_tiles = S // tile_s
    grid = (N, s_tiles)

    patch_spec = pl.BlockSpec((1, KKC, tile_s), lambda n, j: (n, 0, j))
    w_spec = pl.BlockSpec((C_P8, KKC), lambda n, j: (0, 0))
    vec_spec = pl.BlockSpec((C_P8, 1), lambda n, j: (0, 0))
    stat_spec = pl.BlockSpec((1, 1, C_P8, 1), lambda n, j: (n, j, 0, 0))

    # ---- Pass 1: per-tile per-channel sum / sum-of-squares (fully parallel grid,
    # no conv intermediate written to HBM). ----
    psum, psumsq = pl.pallas_call(
        _stats_kernel,
        out_shape=(jax.ShapeDtypeStruct((N, s_tiles, C_P8, 1), jnp.float32),
                   jax.ShapeDtypeStruct((N, s_tiles, C_P8, 1), jnp.float32)),
        grid=grid,
        in_specs=[patch_spec, w_spec, vec_spec],
        out_specs=(stat_spec, stat_spec),
        compiler_params=pltpu.CompilerParams(
            dimension_semantics=("parallel", "parallel"),
            vmem_limit_bytes=vmem_limit),
    )(patches, wT_p, bias_p)

    # ---- tiny XLA epilogue: global batch stats -> BN scale/shift (hoisted out of
    # the per-tile body; variance clamped against E[x^2]-mean^2 cancellation). ----
    m_total = float(N * S)
    mean = jnp.sum(psum, axis=(0, 1)) / m_total                          # (C_P8, 1)
    var = jnp.maximum(jnp.sum(psumsq, axis=(0, 1)) / m_total - mean * mean, 0.0)
    scale = gamma_p * lax.rsqrt(var + eps)
    shift = beta_p - mean * scale

    # ---- Pass 2: recompute GEMM, fused BN affine + ReLU, lane-dense NCHW store. ----
    y = pl.pallas_call(
        _conv_bn_relu_kernel,
        out_shape=jax.ShapeDtypeStruct((N, C_P8, S), jnp.float32),
        grid=grid,
        in_specs=[patch_spec, w_spec, vec_spec, vec_spec, vec_spec],
        out_specs=pl.BlockSpec((1, C_P8, tile_s), lambda n, j: (n, 0, j)),
        compiler_params=pltpu.CompilerParams(
            dimension_semantics=("parallel", "parallel"),
            vmem_limit_bytes=vmem_limit),
    )(patches, wT_p, bias_p, scale, shift)

    if C_P8 != C_out:
        y = y[:, :C_out, :]
    return y.reshape(N, C_out, H_out, W_out)      # already NCHW; reshape is free


def _reference(x, w_t, b, gamma, beta, *, stride, padding, output_padding,
               dilation, eps, input_dtype):
    """Pure-JAX reference (same bf16 conv inputs, f32 accumulation)."""
    K = w_t.shape[2]
    w_conv = jnp.transpose(jnp.flip(w_t, axis=(2, 3)), (1, 0, 2, 3))  # OIHW
    pad_lo = dilation * (K - 1) - padding
    pad_hi = pad_lo + output_padding
    y = lax.conv_general_dilated(
        x.astype(input_dtype), w_conv.astype(input_dtype),
        window_strides=(1, 1),
        padding=((pad_lo, pad_hi), (pad_lo, pad_hi)),
        lhs_dilation=(stride, stride), rhs_dilation=(dilation, dilation),
        dimension_numbers=("NCHW", "OIHW", "NCHW"),
        preferred_element_type=jnp.float32)
    y = y + b.reshape(1, -1, 1, 1)
    mean = jnp.mean(y, axis=(0, 2, 3), keepdims=True)
    var = jnp.mean((y - mean) ** 2, axis=(0, 2, 3), keepdims=True)
    y = (y - mean) * lax.rsqrt(var + eps) * gamma.reshape(1, -1, 1, 1) \
        + beta.reshape(1, -1, 1, 1)
    return jnp.maximum(y, 0.0)


if __name__ == "__main__":
    # config: num_inputs=4, num_outputs=8, kernel_size=3, stride=2, padding=1,
    #         output_padding=1, dilation=1, groups=1
    N, C_in, H, W = 2, 4, 16, 16
    C_out, K = 8, 3
    stride, padding, output_padding, dilation = 2, 1, 1, 1
    eps = 1e-4

    key = jax.random.PRNGKey(0)
    k1, k2, k3, k4, k5 = jax.random.split(key, 5)
    x = jax.random.normal(k1, (N, C_in, H, W), jnp.float32)
    weight_t = 0.1 * jax.random.normal(k2, (C_in, C_out, K, K), jnp.float32)
    bias = 0.1 * jax.random.normal(k3, (C_out,), jnp.float32)
    gamma = 1.0 + 0.1 * jax.random.normal(k4, (C_out,), jnp.float32)
    beta = 0.1 * jax.random.normal(k5, (C_out,), jnp.float32)

    out = conv2dtrans_bn_relu(x, weight_t, bias, gamma, beta,
                              stride=stride, padding=padding,
                              output_padding=output_padding, dilation=dilation,
                              eps=eps)
    out = jax.block_until_ready(out)

    ref = _reference(x, weight_t, bias, gamma, beta, stride=stride,
                     padding=padding, output_padding=output_padding,
                     dilation=dilation, eps=eps, input_dtype=jnp.bfloat16)

    assert out.shape == (N, C_out, 32, 32), out.shape
    err = float(jnp.max(jnp.abs(out - ref)))
    assert err < 2e-3, err
    print("KERNEL_OK")
</pallas_src>

<mosaic_0001>
module attributes {stable_mosaic.version = 11 : i64} {
  func.func @_stats_kernel(%arg0: i32, %arg1: i32, %arg2: memref<1x36x512xbf16, #tpu.memory_space<vmem>>, %arg3: memref<8x36xbf16, #tpu.memory_space<vmem>>, %arg4: memref<8x1xf32, #tpu.memory_space<vmem>>, %arg5: memref<1x1x8x1xf32, #tpu.memory_space<vmem>>, %arg6: memref<1x1x8x1xf32, #tpu.memory_space<vmem>>) attributes {dimension_semantics = [#tpu.dimension_semantics<parallel>, #tpu.dimension_semantics<parallel>], iteration_bounds = array<i64: 2, 2>, scalar_prefetch = 0 : i64, scratch_operands = 0 : i64, tpu.core_type = #tpu.core_type<tc>, window_params = [{transform_indices = @transform_0, window_bounds = array<i64: 1, 36, 512>}, {pipeline_mode = #tpu.pipeline_mode<synchronous>, transform_indices = @transform_1, window_bounds = array<i64: 8, 36>}, {pipeline_mode = #tpu.pipeline_mode<synchronous>, transform_indices = @transform_2, window_bounds = array<i64: 8, 1>}, {transform_indices = @transform_3, window_bounds = array<i64: 1, 1, 8, 1>}, {transform_indices = @transform_4, window_bounds = array<i64: 1, 1, 8, 1>}]} {
    %c0 = arith.constant 0 : index
    %c0_0 = arith.constant 0 : index
    %0 = vector.load %arg3[%c0, %c0_0] : memref<8x36xbf16, #tpu.memory_space<vmem>>, vector<8x36xbf16>
    %c0_1 = arith.constant 0 : index
    %c0_2 = arith.constant 0 : index
    %c0_3 = arith.constant 0 : index
    %1 = vector.load %arg2[%c0_1, %c0_2, %c0_3] : memref<1x36x512xbf16, #tpu.memory_space<vmem>>, vector<1x36x512xbf16>
    %2 = vector.shape_cast %1 : vector<1x36x512xbf16> to vector<36x512xbf16>
    %cst = arith.constant dense<0.000000e+00> : vector<8x512xf32>
    %3 = tpu.matmul %0, %2, %cst {dimension_numbers = #tpu.dot_dimension_numbers<[1], [0], [0], [1], [0, 0, 1, 1], [], []>} : vector<8x36xbf16>, vector<36x512xbf16>, vector<8x512xf32> -> vector<8x512xf32>
    %c0_4 = arith.constant 0 : index
    %c0_5 = arith.constant 0 : index
    %4 = vector.load %arg4[%c0_4, %c0_5] : memref<8x1xf32, #tpu.memory_space<vmem>>, vector<8x1xf32>
    %5 = vector.broadcast %4 : vector<8x1xf32> to vector<8x512xf32>
    %6 = arith.addf %3, %5 : vector<8x512xf32>
    %cst_6 = arith.constant dense<0.000000e+00> : vector<8xf32>
    %7 = vector.multi_reduction <add>, %6, %cst_6 [1] : vector<8x512xf32> to vector<8xf32>
    %8 = vector.shape_cast %7 : vector<8xf32> to vector<8x1xf32>
    %c0_7 = arith.constant 0 : index
    %c0_8 = arith.constant 0 : index
    %c0_9 = arith.constant 0 : index
    %c0_10 = arith.constant 0 : index
    %9 = vector.load %arg5[%c0_7, %c0_8, %c0_9, %c0_10] : memref<1x1x8x1xf32, #tpu.memory_space<vmem>>, vector<1x1x8x1xf32>
    %10 = vector.shape_cast %9 : vector<1x1x8x1xf32> to vector<8x1xf32>
    %11 = vector.shape_cast %8 : vector<8x1xf32> to vector<1x1x8x1xf32>
    tpu.vector_store %arg5[%c0_7, %c0_8, %c0_9, %c0_10], %11 {strides = array<i32>} : memref<1x1x8x1xf32, #tpu.memory_space<vmem>>, vector<1x1x8x1xf32>,
    %12 = arith.mulf %6, %6 : vector<8x512xf32>
    %cst_11 = arith.constant dense<0.000000e+00> : vector<8xf32>
    %13 = vector.multi_reduction <add>, %12, %cst_11 [1] : vector<8x512xf32> to vector<8xf32>
    %14 = vector.shape_cast %13 : vector<8xf32> to vector<8x1xf32>
    %c0_12 = arith.constant 0 : index
    %c0_13 = arith.constant 0 : index
    %c0_14 = arith.constant 0 : index
    %c0_15 = arith.constant 0 : index
    %15 = vector.load %arg6[%c0_12, %c0_13, %c0_14, %c0_15] : memref<1x1x8x1xf32, #tpu.memory_space<vmem>>, vector<1x1x8x1xf32>
    %16 = vector.shape_cast %15 : vector<1x1x8x1xf32> to vector<8x1xf32>
    %17 = vector.shape_cast %14 : vector<8x1xf32> to vector<1x1x8x1xf32>
    tpu.vector_store %arg6[%c0_12, %c0_13, %c0_14, %c0_15], %17 {strides = array<i32>} : memref<1x1x8x1xf32, #tpu.memory_space<vmem>>, vector<1x1x8x1xf32>,
    return
  }
  func.func @transform_0(%arg0: i32, %arg1: i32) -> (i32, i32, i32) {
    %c0_i32 = arith.constant 0 : i32
    %c0_i32_0 = arith.constant 0 : i32
    return %arg0, %c0_i32, %arg1 : i32, i32, i32
  }
  func.func @transform_1(%arg0: i32, %arg1: i32) -> (i32, i32) {
    %c0_i32 = arith.constant 0 : i32
    %c0_i32_0 = arith.constant 0 : i32
    %c0_i32_1 = arith.constant 0 : i32
    return %c0_i32, %c0_i32_0 : i32, i32
  }
  func.func @transform_2(%arg0: i32, %arg1: i32) -> (i32, i32) {
    %c0_i32 = arith.constant 0 : i32
    %c0_i32_0 = arith.constant 0 : i32
    %c0_i32_1 = arith.constant 0 : i32
    return %c0_i32, %c0_i32_0 : i32, i32
  }
  func.func @transform_3(%arg0: i32, %arg1: i32) -> (i32, i32, i32, i32) {
    %c0_i32 = arith.constant 0 : i32
    %c0_i32_0 = arith.constant 0 : i32
    %c0_i32_1 = arith.constant 0 : i32
    return %arg0, %arg1, %c0_i32, %c0_i32_0 : i32, i32, i32, i32
  }
  func.func @transform_4(%arg0: i32, %arg1: i32) -> (i32, i32, i32, i32) {
    %c0_i32 = arith.constant 0 : i32
    %c0_i32_0 = arith.constant 0 : i32
    %c0_i32_1 = arith.constant 0 : i32
    return %arg0, %arg1, %c0_i32, %c0_i32_0 : i32, i32, i32, i32
  }
}

</mosaic_0001>

<bundles_post_ra>
// kernel: tpu_custom_call.1
= control target key start
LH: loop header
LB: loop body
LE: loop exit
PB: predicated region body
PF: predicated region fallthrough
CT: control target
= control target key end

     0   :  { %s772_s15 = smov 0   ;;  %s774_s16 = smov 0   ;;  %s896_s0 = inlined_call_operand.vmem [shape: bf16[2,36,1024], index: 0, kind: input, shape index: {}]   ;;  %s897_s1 = inlined_call_operand.vmem [shape: bf16[8,36], index: 1, kind: input, shape index: {}]   ;;  %s898_s2 = inlined_call_operand.vmem [shape: f32[8,1], index: 2, kind: input, shape index: {}]   ;;  %s899_s3 = inlined_call_operand.vmem [shape: f32[2,2,8,1], index: 3, kind: output, shape index: {0}]   ;;  %s900_s4 = inlined_call_operand.vmem [shape: f32[2,2,8,1], index: 4, kind: output, shape index: {1}]  }
   0x1   :  { %s776_s17 = smov 0   ;;  %s778_s18 = smov 0  }
   0x2   :  { %s780_s19 = smov 0   ;;  %s782_s20 = smov 0  }
   0x3   :  { %s784_s21 = smov 0  }
   0x4 LB: > { %s24_s22 = sadd.s32 1, %s736_s19  ;;  %s27_s23 = sadd.s32 1, %s740_s20  ;;  %s744_s21 = sphi %s784_s21, %s15_s21   ;;  %s740_s20 = sphi %s782_s20, %s906_s20   ;;  %s736_s19 = sphi %s780_s19, %s905_s19   ;;  %s732_s18 = sphi %s778_s18, %s904_s18   ;;  %s728_s17 = sphi %s776_s17, %s903_s17   ;;  %s724_s16 = sphi %s774_s16, %s902_s16   ;;  %s720_s15 = sphi %s772_s15, %s901_s15  }
   0x5   : > { %p25_p0 = scmp.ge.s32.totalorder %s24_s22, 2  ;;  %p43_p1 = scmp.ne.s32.totalorder %s724_s16, %s720_s15 }
   0x6   : > { %p44_p2 = scmp.eq.s32.totalorder %s744_s21, 0  ;;  %s36_s27 = sadd.s32 1, %s724_s16 }
   0x7   : > { %s908_s22 = smov (%p25_p0, %s24_s22), 0  ;;  %s910_s23 = smov (!%p25_p0, %s27_s23), %s740_s20 }
   0x8   : > { %p45_p3 = por %p44_p2, %p43_p1  ;;  %p29_p4 = scmp.ge.s32.totalorder %s910_s23, 2 }
   0x9   : > { %s32_s24 = ssub.s32 %s736_s19, %s908_s22  ;;  %p575_p6 = scmp.ge.s32.totalorder %s744_s21, 4 }
   0xa   : > { %s912_s23 = smov (%p29_p4, %s910_s23), 0 }
   0xb   : > { %s31_s25 = ssub.s32 %s740_s20, %s912_s23  ;;  %173 = sbr.rel (%p575_p6) target bundleno = 34 (0x22), region = 24 }
   0xc   : > { %s33_s26 = sor.u32 %s32_s24, %s31_s25 }
   0xd   : > { %p34_p5 = scmp.eq.s32.totalorder %s33_s26, 0 }
   0xf   : > { %s823_s28 = scalar_select %p34_p5, %s724_s16, %s36_s27  }
  0x10   : > { %176 = sbr.rel (!%p45_p3) target bundleno = 34 (0x22), region = 28  ;;  %s178_s29 = sand.u32 (%p45_p3), 1, %s724_s16  }
  0x11   : > { %s629_s30 = smul.u32 (%p45_p3), 80, %s178_s29  ;;  %s576_s5 = sshll.u32 (%p45_p3), %s736_s19, 2 }
  0x12   : > { %s630_s6 = smul.u32 (%p45_p3), 40, %s740_s20 }
  0x13   : > { %s180_s12 = scalar_lea.vmem (%p45_p3), [#allocation2], %s629_s30 }
  0x14   : > { %s183_s7 = sadd.s32 (%p45_p3), %s630_s6, %s576_s5 }
  0x15   : > { %s577_s8 = sshll.u32 %s183_s7, 2 }
  0x16   : > { %s185_s11 = scalar_lea.vmem %s896_s0, %s577_s8 }
  0x17   : > { %v198_v0 = vld [vmem:[%s185_s11] sm:$0xff]  ;;  %v200_v1 = vld [vmem:[%s185_s11 + $0x8] sm:$0xff] }
  0x18   : > { %v202_v2 = vld [vmem:[%s185_s11 + $0x20] sm:$0xff]  ;;  %199 = vst [vmem:[%s180_s12] sm:$0xff] %v198_v0  ;;  %v204_v3 = vld [vmem:[%s185_s11 + $0x28] sm:$0xff] }
  0x19   : > { %201 = vst [vmem:[%s180_s12 + $0x8] sm:$0xff] %v200_v1  ;;  %v206_v4 = vld [vmem:[%s185_s11 + $0x40] sm:$0xff]  ;;  %v208_v5 = vld [vmem:[%s185_s11 + $0x48] sm:$0xff] }
  0x1a   : > { %203 = vst [vmem:[%s180_s12 + $0x10] sm:$0xff] %v202_v2  ;;  %v210_v6 = vld [vmem:[%s185_s11 + $0x60] sm:$0xff]  ;;  %v212_v7 = vld [vmem:[%s185_s11 + $0x68] sm:$0xff] }
  0x1b   : > { %205 = vst [vmem:[%s180_s12 + $0x18] sm:$0xff] %v204_v3  ;;  %v214_v8 = vld [vmem:[%s185_s11 + $0x80] sm:$0xff]  ;;  %v216_v9 = vld [vmem:[%s185_s11 + $0x88] sm:$0xff] }
  0x1c   : > { %207 = vst [vmem:[%s180_s12 + $0x20] sm:$0xff] %v206_v4 }
  0x1d   : > { %209 = vst [vmem:[%s180_s12 + $0x28] sm:$0xff] %v208_v5 }
  0x1e   : > { %211 = vst [vmem:[%s180_s12 + $0x30] sm:$0xff] %v210_v6 }
  0x1f   : > { %213 = vst [vmem:[%s180_s12 + $0x38] sm:$0xff] %v212_v7 }
  0x20   : > { %215 = vst [vmem:[%s180_s12 + $0x40] sm:$0xff] %v214_v8 }
  0x21   : > { %217 = vst [vmem:[%s180_s12 + $0x48] sm:$0xff] %v216_v9 }
  0x22 PF: > { %p578_p7 = scmp.ge.s32.totalorder %s744_s21, 1  ;;  %p222_p8 = scmp.lt.s32.totalorder %s744_s21, 5 }
  0x24   : > { %p223_p9 = pnand %p578_p7, %p222_p8 }
  0x25   : > { %s229_s13 = sand.u32 (!%p223_p9), 1, %s720_s15   ;;  %p266_p10 = scmp.lt.s32.totalorder (!%p223_p9), %s732_s18, 1 }
  0x26   : > { %226 = sbr.rel (%p223_p9) target bundleno = 317 (0x13d), region = 51  ;;  %p268_p11 = scmp.lt.s32.totalorder (!%p223_p9), %s728_s17, 1 }
  0x27   : > { %s631_s14 = smul.u32 (!%p223_p9), 80, %s229_s13 }
  0x29   : > { %s838_s26 = scalar_lea.vmem (!%p223_p9), [#allocation2], %s631_s14 }
  0x2b   : > { %v746_v10 = vmov 0   ;;  %v294_v11 = vld [vmem:[%s898_s2] sm:$0xff]  ;;  %v293_v13 = vld [vmem:[%s838_s26 + $0x48] sm:$0x33]  ;;  %vm354_vm0 = vcmask 1041408   ;;  %vm350_vm1 = vcmask 293888  }
  0x2c   : > { %689 = vset.pattern.permute.xlu0 %v746_v10  ;;  %v292_v12 = vld [vmem:[%s838_s26 + $0x40] sm:$0x33]  ;;  %v328_v16 = vunpack.c.l.b16 %v293_v13  ;;  %v329_v17 = vunpack.c.h.b16 %v293_v13  ;;  %v627_v19 = vld [vmem:[%s838_s26 + $0x2c] sm:$0xf0]  ;;  %v603_v25 = vld [vmem:[%s838_s26 + $0x30] sm:$0xf0] }
  0x2d   : > { %297 = vperm.xlu0 %689, %v294_v11   ;;  %v326_v14 = vunpack.c.l.b16 %v292_v12  ;;  %v327_v15 = vunpack.c.h.b16 %v292_v12  ;;  %v601_v18 = vld [vmem:[%s838_s26 + $0x20] sm:$0xf]  ;;  %v625_v24 = vld [vmem:[%s838_s26 + $0x24] sm:$0xf]  ;;  %v609_v26 = vld [vmem:[%s838_s26 + $0x28] sm:$0xf] }
  0x2e   : > { %v340_v22 = vpack.c.b16 %v328_v16, %v328_v16  ;;  %v341_v23 = vpack.c.b16 %v329_v17, %v329_v17  ;;  %v628_v27 = vld [vmem:[%s838_s26 + $0x34] sm:$0xf0]  ;;  %v626_v28 = vld [vmem:[%s838_s26 + $0x2c] sm:$0xf]  ;;  %v611_v29 = vld [vmem:[%s838_s26 + $0x38] sm:$0xf0]  ;;  %v602_v34 = vor.u32 %v627_v19, %v601_v18  ;;  %v606_v35 = vor.u32 %v625_v24, %v603_v25 }
  0x2f   : > { %v338_v20 = vpack.c.b16 %v326_v14, %v326_v14  ;;  %v339_v21 = vpack.c.b16 %v327_v15, %v327_v15  ;;  %v585_v36 = vld [vmem:[%s838_s26] sm:$0xf]  ;;  %v623_v37 = vld [vmem:[%s838_s26 + $0xc] sm:$0xf0]  ;;  %v610_v38 = vor.u32 %v628_v27, %v609_v26  ;;  %v614_v39 = vor.u32 %v626_v28, %v611_v29  ;;  %v621_v40 = vld [vmem:[%s838_s26 + $0x4] sm:$0xf] }
  0x30   : > { %v362_v32 = vsel %vm354_vm0, %v340_v22, 0  ;;  %v365_v33 = vsel %vm354_vm0, %v341_v23, 0  ;;  %v587_v41 = vld [vmem:[%s838_s26 + $0x10] sm:$0xf0]  ;;  %v593_v42 = vld [vmem:[%s838_s26 + $0x8] sm:$0xf]  ;;  %v586_v46 = vor.u32 %v623_v37, %v585_v36 }
  0x31   : > { %v356_v30 = vsel %vm354_vm0, %v338_v20, 0  ;;  %v359_v31 = vsel %vm354_vm0, %v339_v21, 0  ;;  %398 = vmatpush.bf16.msra.mxu2 %v362_v32  ;;  %411 = vmatpush.bf16.msra.mxu3 %v365_v33  ;;  %v624_v43 = vld [vmem:[%s838_s26 + $0x14] sm:$0xf0]  ;;  %v622_v44 = vld [vmem:[%s838_s26 + $0xc] sm:$0xf]  ;;  %v590_v47 = vor.u32 %v621_v40, %v587_v41 }
  0x32   : > { %372 = vmatpush.bf16.msra.mxu0 %v356_v30  ;;  %385 = vmatpush.bf16.msra.mxu1 %v359_v31  ;;  %v595_v45 = vld [vmem:[%s838_s26 + $0x18] sm:$0xf0]  ;;  %v594_v48 = vor.u32 %v624_v43, %v593_v42  ;;  %v283_v50 = vld [vmem:[%s897_s1] sm:$0xf]  ;;  %s914_s18 = smov (!%p266_p10, %s732_s18), 1  ;;  %s916_s17 = smov (!%p268_p11, %s728_s17), 1 }
  0x33   : > { %v598_v49 = vor.u32 %v622_v44, %v595_v45  ;;  %s579_s29 = sshll.u32 %s914_s18, 1  ;;  %vm424_vm2 = vcmask 7168  }
  0x34   : > { %s271_s30 = sadd.s32 %s579_s29, %s916_s17 }
  0x35   : > { %399 = vmatpush.bf16.msra.mxu2 %v610_v38  ;;  %412 = vmatpush.bf16.msra.mxu3 %v614_v39  ;;  %s580_s5 = sshll.u32 %s271_s30, 3 }
  0x36   : > { %373 = vmatpush.bf16.msra.mxu0 %v602_v34  ;;  %386 = vmatpush.bf16.msra.mxu1 %v606_v35  ;;  %s273_s8 = scalar_lea.vmem %s899_s3, %s580_s5  ;;  %s281_s11 = scalar_lea.vmem %s900_s4, %s580_s5 }
  0x39   : > { %400 = vmatpush.bf16.msra.mxu2 %v594_v48  ;;  %413 = vmatpush.bf16.msra.mxu3 %v598_v49 }
  0x3a   : > { %374 = vmatpush.bf16.msra.mxu0 %v586_v46  ;;  %387 = vmatpush.bf16.msra.mxu1 %v590_v47 }
  0x3c   : > { %617 = vmatmul.msk.bf16.vlgmr.msra.gmra.mxu2 %vm350_vm1, %v283_v50  ;;  %618 = vmatmul.msk.bf16.vlgmr.msra.gmra.mxu3 %vm350_vm1, %v283_v50 }
  0x3d   : > { %615 = vmatmul.msk.bf16.vlgmr.msra.gmra.mxu0 %vm350_vm1, %v283_v50  ;;  %616 = vmatmul.msk.bf16.vlgmr.msra.gmra.mxu1 %vm350_vm1, %v283_v50 }
  0x9f   : > { %v298_v51 = vpop.permute.xlu0 %297 }
  0xba   : > { %v376_v52 = vpop.f32.mrf.mxu0  ;;  %v389_v53 = vpop.f32.mrf.mxu1 }
  0xbb   : > { %v377_v54 = vadd.f32 %v376_v52, %v298_v51  ;;  %v390_v55 = vadd.f32 %v389_v53, %v298_v51 }
  0xbd   : > { %v426_v56 = vmul.f32 %v377_v54, %v377_v54  ;;  %v427_v57 = vmul.f32 %v390_v55, %v390_v55  ;;  %v419_v58 = vadd.f32 %v390_v55, %v377_v54 }
  0xbf   : > { %v402_v59 = vpop.f32.mrf.mxu2  ;;  %v415_v60 = vpop.f32.mrf.mxu3  ;;  %v430_v1 = vadd.f32 %v427_v57, %v426_v56 }
  0xc0   : > { %v403_v61 = vadd.f32 %v402_v59, %v298_v51  ;;  %v416_v62 = vadd.f32 %v415_v60, %v298_v51 }
  0xc2   : > { %v378_v63 = vpop.f32.mrf.mxu0  ;;  %v391_v0 = vpop.f32.mrf.mxu1  ;;  %v420_v2 = vadd.f32 %v419_v58, %v403_v61  ;;  %v428_v3 = vmul.f32 %v403_v61, %v403_v61  ;;  %v429_v5 = vmul.f32 %v416_v62, %v416_v62 }
  0xc4   : > { %v421_v4 = vadd.f32 %v420_v2, %v416_v62  ;;  %v431_v6 = vadd.f32 %v430_v1, %v428_v3 }
  0xc6   : > { %422 = vadd.xlane.f32.xlu0 %v421_v4  ;;  %v432_v7 = vadd.f32 %v431_v6, %v429_v5 }
  0xc7   : > { %v404_v8 = vpop.f32.mrf.mxu2  ;;  %v417_v9 = vpop.f32.mrf.mxu3 }
  0xc8   : > { %433 = vadd.xlane.f32.xlu1 %v432_v7 }
 0x139   : > { %v423_v10 = vpop.xlane.xlu0 %422 }
 0x13a   : > { %425 = vst.msk [vmem:[%s273_s8] sm:$0xff] %vm424_vm2, %v423_v10 }
 0x13b   : > { %v434_v11 = vpop.xlane.xlu1 %433 }
 0x13c   : > { %435 = vst.msk [vmem:[%s281_s11] sm:$0xff] %vm424_vm2, %v434_v11 }
 0x13d PF: > { %s15_s21 = sadd.s32 1, %s744_s21   ;;  %s901_s15 = smov %s724_s16 }
 0x13e   : > { %p12_p12 = scmp.ge.s32.totalorder %s15_s21, 6   ;;  %s902_s16 = smov %s823_s28 }
 0x13f   : > { %s903_s17 = smov %s736_s19  ;;  %s904_s18 = smov %s740_s20 }
 0x140   : > { %s905_s19 = smov %s908_s22  ;;  %s906_s20 = smov %s912_s23 }
 0x141   :  { %14 = sbr.rel (!%p12_p12) target bundleno = 4 (0x4), region = 102 }

</bundles_post_ra>
